<compile_context>
chip_gen: v7x
topology: tpu7x:2x2x1
jax: 0.10.0
libtpu: 0.0.40
codegen_flags: <defaults>
</compile_context>

<pallas_src>
import jax
import jax.numpy as jnp
from jax.experimental import pallas as pl
from jax.experimental.pallas import tpu as pltpu


# ---------------------------------------------------------------------------
# Kernels
# ---------------------------------------------------------------------------

def _linear_bias_kernel(x_ref, w_ref, b_ref, o_ref, acc_ref):
    # x_ref: (tm, tk), w_ref: (tk, tn) pre-transposed, b_ref: (1, tn), o_ref: (tm, tn)
    @pl.when(pl.program_id(2) == 0)
    def _():
        acc_ref[...] = jnp.zeros_like(acc_ref)

    # Pure MXU accumulate in the hot K loop (no transpose, no bias here).
    acc_ref[...] += jnp.dot(x_ref[...], w_ref[...],
                            preferred_element_type=jnp.float32)

    # Finalize-only epilogue: bias add + downcast + store once per (i, j) tile.
    @pl.when(pl.program_id(2) == pl.num_programs(2) - 1)
    def _():
        o_ref[...] = (acc_ref[...] + b_ref[...].astype(jnp.float32)).astype(o_ref.dtype)


def _linear_nobias_kernel(x_ref, w_ref, o_ref, acc_ref):
    @pl.when(pl.program_id(2) == 0)
    def _():
        acc_ref[...] = jnp.zeros_like(acc_ref)

    acc_ref[...] += jnp.dot(x_ref[...], w_ref[...],
                            preferred_element_type=jnp.float32)

    @pl.when(pl.program_id(2) == pl.num_programs(2) - 1)
    def _():
        o_ref[...] = acc_ref[...].astype(o_ref.dtype)


# ---------------------------------------------------------------------------
# Tile / VMEM selection
# ---------------------------------------------------------------------------

def _round_up(v, m):
    return ((v + m - 1) // m) * m


def _cdiv(a, b):
    return (a + b - 1) // b


def _sublane_multiple(dtype):
    # f32 -> 8, bf16/f16 -> 16, int8/fp8 -> 32 (packed sublanes).
    return max(8, 32 // jnp.dtype(dtype).itemsize)


def _vmem_budget_bytes():
    """Scoped-VMEM budget: generation-aware, always below physical capacity."""
    cap = 128 * 1024 * 1024
    try:
        info = pltpu.get_tpu_info()
        cap = int(getattr(info, "vmem_capacity_bytes", cap))
    except Exception:
        pass
    # Leave headroom for Mosaic-internal scratch; never request physical VMEM.
    # 128 MiB chips (v5e/v6e) -> 100 MiB; 64 MiB chips (v7x) -> 48 MiB.
    return max(min(cap - 16 * 1024 * 1024, 100 * 1024 * 1024), 16 * 1024 * 1024)


def _pick_tile(dim, max_tile, align):
    """Largest tile <= ~max_tile, aligned, with at most ~one tile of waste."""
    if dim <= align:
        return dim                        # == full array dim (always legal)
    if dim <= max_tile:
        return _round_up(dim, align)      # single block along this axis
    n_chunks = _cdiv(dim, max_tile)
    return _round_up(_cdiv(dim, n_chunks), align)


def _select_tiles(M, K, N, in_dtype, out_dtype, has_bias):
    in_isz = jnp.dtype(in_dtype).itemsize
    out_isz = jnp.dtype(out_dtype).itemsize
    sub_m = _sublane_multiple(in_dtype)

    # Caps: large enough to be MXU-bound on v5e/v6e/v7x, small enough to fit
    # the ~48 MiB v7x budget with double-buffered pipelining.
    if in_isz >= 4:
        tm_max, tn_max, tk_max = 512, 1024, 2048
    else:
        tm_max, tn_max, tk_max = 1024, 1024, 2048

    tm = _pick_tile(M, tm_max, sub_m)
    tn = _pick_tile(N, tn_max, 128)
    # K is the reduction axis: partial blocks would pollute valid outputs, so
    # either take the full (exact) K in one step or use an aligned tile + pad.
    tk = K if K <= tk_max else _round_up(_cdiv(K, _cdiv(K, tk_max)), 128)

    budget = _vmem_budget_bytes()

    def usage(tm_, tn_, tk_):
        u = 2 * (tm_ * tk_ + tk_ * tn_) * in_isz   # double-buffered inputs
        u += 2 * tm_ * tn_ * out_isz               # double-buffered output
        u += tm_ * tn_ * 4                         # f32 accumulator scratch
        if has_bias:
            u += 2 * tn_ * 4
        return u

    # Safety shrink loop (rarely triggers with the caps above).
    while usage(tm, tn, tk) > budget:
        if tk >= 256:
            tk = _round_up(tk // 2, 128)
        elif tn >= 256:
            tn = _round_up(tn // 2, 128)
        elif tm > sub_m:
            tm = _round_up(max(tm // 2, sub_m), sub_m)
        else:
            break

    # Skinny-M megacore fix: ensure the parallel grid has >= 2 tiles when
    # possible so both v7x TensorCores get work.
    if _cdiv(M, tm) * _cdiv(N, tn) < 2 and tn >= 256:
        tn = _round_up(tn // 2, 128)

    return tm, tn, tk, budget


# ---------------------------------------------------------------------------
# Wrapper
# ---------------------------------------------------------------------------

def _linear_pretransposed(x2d, w_t, bias, out_dtype):
    """y = x2d @ w_t (+ bias).  x2d: (M, K), w_t: (K, N) pre-transposed."""
    M, K = x2d.shape
    K_w, N = w_t.shape
    assert K == K_w
    has_bias = bias is not None

    tm, tn, tk, vmem_budget = _select_tiles(M, K, N, x2d.dtype, out_dtype, has_bias)

    # Only K genuinely needs zero padding (reduction correctness); ragged M/N
    # are handled via partial blocks (garbage rows/cols never stored).
    K_pad = _round_up(K, tk)
    if K_pad != K:
        x2d = jnp.pad(x2d, ((0, 0), (0, K_pad - K)))
        w_t = jnp.pad(w_t, ((0, K_pad - K), (0, 0)))

    gm, gn, gk = _cdiv(M, tm), _cdiv(N, tn), K_pad // tk
    grid = (gm, gn, gk)

    x_spec = pl.BlockSpec((tm, tk), lambda i, j, k: (i, k))
    w_spec = pl.BlockSpec((tk, tn), lambda i, j, k: (k, j))
    o_spec = pl.BlockSpec((tm, tn), lambda i, j, k: (i, j))

    out_shape = jax.ShapeDtypeStruct((M, N), out_dtype)
    scratch_shapes = [pltpu.VMEM((tm, tn), jnp.float32)]

    compiler_params = pltpu.CompilerParams(
        dimension_semantics=("parallel", "parallel", "arbitrary"),
        vmem_limit_bytes=int(vmem_budget),
    )

    in_isz = jnp.dtype(x2d.dtype).itemsize
    out_isz = jnp.dtype(out_dtype).itemsize
    cost = pl.CostEstimate(
        flops=2 * (gm * tm) * (gn * tn) * K_pad,
        transcendentals=0,
        bytes_accessed=(gn * M * K_pad * in_isz      # x re-read once per N tile
                        + gm * K_pad * N * in_isz    # W re-read once per M tile
                        + M * N * out_isz),
    )

    if has_bias:
        b2d = bias.reshape(1, N)
        b_spec = pl.BlockSpec((1, tn), lambda i, j, k: (0, j))
        return pl.pallas_call(
            _linear_bias_kernel,
            out_shape=out_shape,
            grid=grid,
            in_specs=[x_spec, w_spec, b_spec],
            out_specs=o_spec,
            scratch_shapes=scratch_shapes,
            compiler_params=compiler_params,
            cost_estimate=cost,
        )(x2d, w_t, b2d)

    return pl.pallas_call(
        _linear_nobias_kernel,
        out_shape=out_shape,
        grid=grid,
        in_specs=[x_spec, w_spec],
        out_specs=o_spec,
        scratch_shapes=scratch_shapes,
        compiler_params=compiler_params,
        cost_estimate=cost,
    )(x2d, w_t)


class FastLinear:
    """Pallas TPU equivalent of the PyTorch FastLinear module (F.linear).

    The (out_features, in_features) weight is transposed ONCE at construction
    so every forward call feeds the MXU in native (K, N) layout with no
    per-call relayout or weight-pad copy.
    """

    def __init__(self, weight, bias=None):
        weight = jnp.asarray(weight)                       # (N, K) PyTorch layout
        self.w_t = jnp.asarray(weight.T)                   # (K, N), one-time relayout
        self.bias = None if bias is None else jnp.asarray(bias)

    def __call__(self, x):
        *batch_dims, in_features = x.shape
        assert in_features == self.w_t.shape[0]
        x2d = x.reshape(-1, in_features)
        out2d = _linear_pretransposed(x2d, self.w_t, self.bias, x.dtype)
        return out2d.reshape(*batch_dims, self.w_t.shape[1])


def fast_linear(x, weight, bias=None):
    """One-shot functional form of FastLinear.forward."""
    return FastLinear(weight, bias)(x)


# ---------------------------------------------------------------------------
# Self-test
# ---------------------------------------------------------------------------

if __name__ == "__main__":
    key = jax.random.PRNGKey(0)
    k_x, k_w, k_b, k_x2, k_w2 = jax.random.split(key, 5)

    batch, seq, hidden, out_features = 2, 8, 32, 64

    x = jax.random.normal(k_x, (batch, seq, hidden), dtype=jnp.float32)
    weight = jax.random.normal(k_w, (out_features, hidden), dtype=jnp.float32) * 0.05
    bias = jax.random.normal(k_b, (out_features,), dtype=jnp.float32) * 0.1

    # With bias (module-style: weight transposed once at init).
    layer = FastLinear(weight, bias)
    y = jax.block_until_ready(layer(x))
    y_ref = x @ weight.T + bias
    assert y.shape == (batch, seq, out_features)
    assert jnp.allclose(y, y_ref, atol=1e-5, rtol=1e-5)

    # Without bias (functional form).
    y_nb = jax.block_until_ready(fast_linear(x, weight, None))
    y_nb_ref = x @ weight.T
    assert jnp.allclose(y_nb, y_nb_ref, atol=1e-5, rtol=1e-5)

    # Ragged shapes (M, K, N not multiples of the tile alignments) — exercises
    # the partial-block / no-padding path.
    x_r = jax.random.normal(k_x2, (3, 5, 40), dtype=jnp.float32)
    w_r = jax.random.normal(k_w2, (72, 40), dtype=jnp.float32) * 0.05
    y_r = jax.block_until_ready(fast_linear(x_r, w_r, None))
    y_r_ref = x_r @ w_r.T
    assert y_r.shape == (3, 5, 72)
    assert jnp.allclose(y_r, y_r_ref, atol=1e-5, rtol=1e-5)

    print("KERNEL_OK")
</pallas_src>

<mosaic_0001>
module attributes {stable_mosaic.version = 11 : i64} {
  func.func @_linear_bias_kernel(%arg0: i32, %arg1: i32, %arg2: i32, %arg3: memref<16x32xf32, #tpu.memory_space<vmem>>, %arg4: memref<32x64xf32, #tpu.memory_space<vmem>>, %arg5: memref<1x64xf32, #tpu.memory_space<vmem>>, %arg6: memref<16x64xf32, #tpu.memory_space<vmem>>, %arg7: memref<16x64xf32, #tpu.memory_space<vmem>>) attributes {dimension_semantics = [#tpu.dimension_semantics<parallel>, #tpu.dimension_semantics<parallel>, #tpu.dimension_semantics<arbitrary>], iteration_bounds = array<i64: 1, 1, 1>, scalar_prefetch = 0 : i64, scratch_operands = 1 : i64, tpu.core_type = #tpu.core_type<tc>, window_params = [{transform_indices = @transform_0, window_bounds = array<i64: 16, 32>}, {transform_indices = @transform_1, window_bounds = array<i64: 32, 64>}, {transform_indices = @transform_2, window_bounds = array<i64: 1, 64>}, {transform_indices = @transform_3, window_bounds = array<i64: 16, 64>}]} {
    %c0_i32 = arith.constant 0 : i32
    %0 = arith.cmpi eq, %arg2, %c0_i32 : i32
    %1 = arith.extui %0 : i1 to i32
    %c0_i32_0 = arith.constant 0 : i32
    %2 = arith.cmpi ne, %1, %c0_i32_0 : i32
    scf.if %2 {
      %cst_10 = arith.constant 0.000000e+00 : f32
      %12 = vector.broadcast %cst_10 : f32 to vector<16x64xf32>
      %c0_11 = arith.constant 0 : index
      %c0_12 = arith.constant 0 : index
      %13 = vector.load %arg7[%c0_11, %c0_12] : memref<16x64xf32, #tpu.memory_space<vmem>>, vector<16x64xf32>
      tpu.vector_store %arg7[%c0_11, %c0_12], %12 {strides = array<i32>} : memref<16x64xf32, #tpu.memory_space<vmem>>, vector<16x64xf32>,
    } else {
    }
    %c0 = arith.constant 0 : index
    %c0_1 = arith.constant 0 : index
    %3 = vector.load %arg7[%c0, %c0_1] : memref<16x64xf32, #tpu.memory_space<vmem>>, vector<16x64xf32>
    %c0_2 = arith.constant 0 : index
    %c0_3 = arith.constant 0 : index
    %4 = vector.load %arg3[%c0_2, %c0_3] : memref<16x32xf32, #tpu.memory_space<vmem>>, vector<16x32xf32>
    %c0_4 = arith.constant 0 : index
    %c0_5 = arith.constant 0 : index
    %5 = vector.load %arg4[%c0_4, %c0_5] : memref<32x64xf32, #tpu.memory_space<vmem>>, vector<32x64xf32>
    %cst = arith.constant dense<0.000000e+00> : vector<16x64xf32>
    %6 = tpu.matmul %4, %5, %cst {dimension_numbers = #tpu.dot_dimension_numbers<[1], [0], [0], [1], [0, 0, 1, 1], [], []>} : vector<16x32xf32>, vector<32x64xf32>, vector<16x64xf32> -> vector<16x64xf32>
    %7 = arith.addf %3, %6 : vector<16x64xf32>
    %c0_6 = arith.constant 0 : index
    %c0_7 = arith.constant 0 : index
    %8 = vector.load %arg7[%c0_6, %c0_7] : memref<16x64xf32, #tpu.memory_space<vmem>>, vector<16x64xf32>
    tpu.vector_store %arg7[%c0_6, %c0_7], %7 {strides = array<i32>} : memref<16x64xf32, #tpu.memory_space<vmem>>, vector<16x64xf32>,
    %c0_i32_8 = arith.constant 0 : i32
    %9 = arith.cmpi eq, %arg2, %c0_i32_8 : i32
    %10 = arith.extui %9 : i1 to i32
    %c0_i32_9 = arith.constant 0 : i32
    %11 = arith.cmpi ne, %10, %c0_i32_9 : i32
    scf.if %11 {
      %c0_10 = arith.constant 0 : index
      %c0_11 = arith.constant 0 : index
      %12 = vector.load %arg7[%c0_10, %c0_11] : memref<16x64xf32, #tpu.memory_space<vmem>>, vector<16x64xf32>
      %c0_12 = arith.constant 0 : index
      %c0_13 = arith.constant 0 : index
      %13 = vector.load %arg5[%c0_12, %c0_13] : memref<1x64xf32, #tpu.memory_space<vmem>>, vector<1x64xf32>
      %14 = vector.broadcast %13 : vector<1x64xf32> to vector<16x64xf32>
      %15 = arith.addf %12, %14 : vector<16x64xf32>
      %c0_14 = arith.constant 0 : index
      %c0_15 = arith.constant 0 : index
      %16 = vector.load %arg6[%c0_14, %c0_15] : memref<16x64xf32, #tpu.memory_space<vmem>>, vector<16x64xf32>
      tpu.vector_store %arg6[%c0_14, %c0_15], %15 {strides = array<i32>} : memref<16x64xf32, #tpu.memory_space<vmem>>, vector<16x64xf32>,
    } else {
    }
    return
  }
  func.func @transform_0(%arg0: i32, %arg1: i32, %arg2: i32) -> (i32, i32) {
    %c0_i32 = arith.constant 0 : i32
    return %arg0, %arg2 : i32, i32
  }
  func.func @transform_1(%arg0: i32, %arg1: i32, %arg2: i32) -> (i32, i32) {
    %c0_i32 = arith.constant 0 : i32
    return %arg2, %arg1 : i32, i32
  }
  func.func @transform_2(%arg0: i32, %arg1: i32, %arg2: i32) -> (i32, i32) {
    %c0_i32 = arith.constant 0 : i32
    %c0_i32_0 = arith.constant 0 : i32
    return %c0_i32, %arg1 : i32, i32
  }
  func.func @transform_3(%arg0: i32, %arg1: i32, %arg2: i32) -> (i32, i32) {
    %c0_i32 = arith.constant 0 : i32
    return %arg0, %arg1 : i32, i32
  }
}

</mosaic_0001>

<bundles_post_ra>
// kernel: tpu_custom_call.1
= control target key start
LH: loop header
LB: loop body
LE: loop exit
PB: predicated region body
PF: predicated region fallthrough
CT: control target
= control target key end

     0   :  { %8 = vsyncpa [#allocation4], 0  ;;  %s416_s0 = inlined_call_operand.hbm [shape: f32[16,32], index: 0, kind: input, shape index: {}]   ;;  %s417_s1 = inlined_call_operand.hbm [shape: f32[32,64], index: 1, kind: input, shape index: {}]   ;;  %s418_s2 = inlined_call_operand.hbm [shape: f32[1,64], index: 2, kind: input, shape index: {}]   ;;  %s419_s3 = inlined_call_operand.hbm [shape: f32[16,64], index: 3, kind: output, shape index: {}]  }
   0x1   :  { %9 = vsyncpa [#allocation7], 0 }
   0x2   :  { %10 = vsyncpa [#allocation5], 0  ;;  %s319_s12 = smov [#allocation6]   ;;  %s320_s14 = smov [#allocation3]  }
   0x3   :  { %s28_s13 = sshll.u32 %s319_s12, 4  ;;  %s16_s15 = sshll.u32 %s320_s14, 4  ;;  %s29_s13 = int_to_ptr.vmem [resolvable:$true] %s28_s13  ;;  %s346_s15 = int_to_ptr.vmem [resolvable:$true] %s16_s15 }
   0x4   :  { %s225_s18 = scalar_lea.hbm %s417_s1, 512 }
   0x5   :  { %p226_p0 = scmp.ne.s32.totalorder %s417_s1, %s225_s18  ;;  %p229_p1 = scmp.lt.u32.totalorder %s225_s18, %s417_s1 }
   0x7   :  { %p231_p2 = pnand %p229_p1, %p226_p0 }
   0x9   :  { %234 = shalt.err (!%p231_p2)
}
   0xa   :  { %s235_s23 = scalar_lea.vmem %s29_s13, 512  ;;  %p240_p4 = scmp.lt.s32.totalorder %s29_s13, %s29_s13 }
   0xb   :  { %p236_p3 = scmp.ne.s32.totalorder %s29_s13, %s235_s23  ;;  %p241_p5 = scmp.lt.s32.totalorder %s235_s23, %s235_s23 }
   0xd   :  { %p242_p6 = por %p241_p5, %p240_p4 }
   0xf   :  { %p243_p7 = pnand %p242_p6, %p236_p3 }
  0x11   :  { %246 = shalt.err (!%p243_p7)
}
  0x12   :  { %s321_s24 = smov 128   ;;  %s322_s25 = smov 8  }
  0x13   :  { %34 = dma.hbm_to_vmem [thread:$0]  %s417_s1, 512, %s29_s13, [#allocation7], %s321_s24, %s321_s24, %s322_s25  }
  0x14   :  { %s247_s30 = scalar_lea.hbm %s416_s0, 256 }
  0x15   :  { %p248_p8 = scmp.ne.s32.totalorder %s416_s0, %s247_s30  ;;  %p251_p9 = scmp.lt.u32.totalorder %s247_s30, %s416_s0 }
  0x17   :  { %p253_p10 = pnand %p251_p9, %p248_p8 }
  0x19   :  { %256 = shalt.err (!%p253_p10)
}
  0x1a   :  { %s257_s8 = scalar_lea.vmem %s346_s15, 256  ;;  %p262_p12 = scmp.lt.s32.totalorder %s346_s15, %s346_s15 }
  0x1b   :  { %p258_p11 = scmp.ne.s32.totalorder %s346_s15, %s257_s8  ;;  %p263_p13 = scmp.lt.s32.totalorder %s257_s8, %s257_s8 }
  0x1d   :  { %p264_p0 = por %p263_p13, %p262_p12 }
  0x1f   :  { %p265_p1 = pnand %p264_p0, %p258_p11 }
  0x21   :  { %268 = shalt.err (!%p265_p1)
}
  0x22   :  { %22 = dma.hbm_to_vmem [thread:$0]  %s416_s0, 256, %s346_s15, [#allocation4], %s321_s24, %s321_s24, %s322_s25  }
  0x23   :  { %s323_s10 = smov [#allocation8]   ;;  %s269_s14 = scalar_lea.hbm %s418_s2, 16 }
  0x24   :  { %s41_s11 = sshll.u32 %s323_s10, 4  ;;  %p270_p2 = scmp.ne.s32.totalorder %s418_s2, %s269_s14  ;;  %s42_s11 = int_to_ptr.vmem [resolvable:$true] %s41_s11 }
  0x25   :  { %p273_p3 = scmp.lt.u32.totalorder %s269_s14, %s418_s2 }
  0x27   :  { %p275_p4 = pnand %p273_p3, %p270_p2 }
  0x29   :  { %278 = shalt.err (!%p275_p4)
}
  0x2a   :  { %s279_s20 = scalar_lea.vmem %s42_s11, 16  ;;  %s283_s0 = scalar_lea.vmem %s42_s11, 32 }
  0x2b   :  { %p280_p5 = scmp.ne.s32.totalorder %s42_s11, %s279_s20  ;;  %p284_p6 = scmp.lt.s32.totalorder %s42_s11, %s42_s11 }
  0x2c   :  { %p285_p7 = scmp.lt.s32.totalorder %s283_s0, %s279_s20 }
  0x2e   :  { %p286_p8 = por %p285_p7, %p284_p6 }
  0x30   :  { %p287_p9 = pnand %p286_p8, %p280_p5 }
  0x32   :  { %290 = shalt.err (!%p287_p9)
}
  0x33   :  { %44 = dma.hbm_to_vmem [thread:$0]  %s418_s2, 16, %s42_s11, [#allocation7]  }
  0x34   :  { %313 = dma.done.wait [#allocation4], 256  }
  0x35   :  { %314 = vsyncadd [#allocation4], 4294967040 }
  0x36   :  { %315 = dma.done.wait [#allocation7], 528  }
  0x37   :  { %316 = vsyncadd [#allocation7], 4294966768  ;;  %vm58_vm0 = vcmask 523264   ;;  %v324_v0 = vmov 0.0   ;;  %vm69_vm1 = vcmask 261120   ;;  %v65_v1 = vld [vmem:[#allocation6] sm:$0xff] }
  0x38   :  { %60 = vst.msk [vmem:[#allocation2 + $0x8] sm:$0xff] %vm58_vm0, %v324_v0  ;;  %59 = vst.msk [vmem:[#allocation2] sm:$0xff] %vm58_vm0, %v324_v0  ;;  %v66_v2 = vld [vmem:[#allocation6 + $0x8] sm:$0xff]  ;;  %v67_v3 = vld [vmem:[#allocation6 + $0x10] sm:$0xff]  ;;  %s325_s2 = smov [#allocation9]  }
  0x39   :  { %v210_v4 = vpack.c.bf16 %v66_v2, %v65_v1  ;;  %v68_v5 = vld [vmem:[#allocation6 + $0x18] sm:$0xff]  ;;  %v63_v6 = vld [vmem:[#allocation3] sm:$0xff]  ;;  %v192_v15 = vld [vmem:[#allocation8] ss:$0 sm:$0xff]  ;;  %s177_s22 = sshll.u32 %s325_s2, 4  ;;  %s178_s22 = int_to_ptr.vmem [resolvable:$true] %s177_s22 }
  0x3a   :  { %v214_v7 = vpack.c.bf16 %v68_v5, %v67_v3  ;;  %207 = vmatprep.mubr.msk.f32.mxu0 %vm69_vm1, %v63_v6  ;;  %v64_v8 = vld [vmem:[#allocation3 + $0x8] sm:$0xff]  ;;  %s291_s23 = scalar_lea.vmem %s178_s22, 256  ;;  %p296_p11 = scmp.lt.s32.totalorder %s178_s22, %s178_s22 }
  0x3b   :  { %211 = vmatprep.subr.bf16.mxu0 %v210_v4  ;;  %p292_p10 = scmp.ne.s32.totalorder %s178_s22, %s291_s23  ;;  %p297_p12 = scmp.lt.s32.totalorder %s291_s23, %s291_s23 }
  0x3c   :  { %213 = vmatpush3.bf16.msra.mxu0 %v210_v4 }
  0x3d   :  { %215 = vmatprep.subr.bf16.mxu0 %v214_v7  ;;  %p298_p13 = por %p297_p12, %p296_p11 }
  0x3f   :  { %v62_v9 = vld [vmem:[#allocation2 + $0x8] sm:$0xff]  ;;  %v61_v10 = vld [vmem:[#allocation2] sm:$0xff]  ;;  %p299_p0 = pnand %p298_p13, %p292_p10 }
  0x40   :  { %217 = vmatpush3.bf16.msra.mxu0 %v214_v7 }
  0x43   :  { %208 = vmatmul.mubr.msk.f32.vlgmr.msra.gmra.mrb[0].mxu0 %vm69_vm1, %v64_v8 }
 0x116   :  { %v209_v11 = vpop.f32.mrb[0].mxu0 }
 0x117   :  { %v152_v12 = vadd.f32 %v209_v11, %v62_v9  ;;  %v142_v13 = vpop.f32.mrb[1].mxu0 }
 0x118   :  { %v151_v14 = vadd.f32 %v142_v13, %v61_v10 }
 0x119   :  { %155 = vst.msk [vmem:[#allocation2 + $0x8] sm:$0xff] %vm58_vm0, %v152_v12 }
 0x11a   :  { %154 = vst.msk [vmem:[#allocation2] sm:$0xff] %vm58_vm0, %v151_v14 }
 0x120   :  { %v160_v16 = vld [vmem:[#allocation2 + $0x8] sm:$0xff] }
 0x121   :  { %v159_v17 = vld [vmem:[#allocation2] sm:$0xff]  ;;  %v169_v18 = vadd.f32 %v192_v15, %v160_v16 }
 0x122   :  { %v168_v19 = vadd.f32 %v192_v15, %v159_v17 }
 0x123   :  { %171 = vst.msk [vmem:[#allocation9 + $0x8] sm:$0xff] %vm58_vm0, %v169_v18 }
 0x124   :  { %170 = vst.msk [vmem:[#allocation9] sm:$0xff] %vm58_vm0, %v168_v19 }
 0x125   :  { %302 = shalt.err (!%p299_p0)
}
 0x126   :  { %s303_s28 = scalar_lea.hbm %s419_s3, 256 }
 0x127   :  { %p304_p1 = scmp.ne.s32.totalorder %s419_s3, %s303_s28  ;;  %p307_p2 = scmp.lt.u32.totalorder %s303_s28, %s419_s3 }
 0x129   :  { %p309_p3 = pnand %p307_p2, %p304_p1 }
 0x12b   :  { %312 = shalt.err (!%p309_p3)
}
 0x12c   :  { %183 = dma.vmem_to_hbm [thread:$0]  %s178_s22, 256, %s419_s3, [#allocation5], %s321_s24, %s321_s24, %s322_s25  }
 0x12d   :  { %317 = dma.done.wait [#allocation5], 256  }
 0x12e   :  { %318 = vsyncadd [#allocation5], 4294967040 }
 0x12f   :  { %187 = vsyncpa [#allocation4], 1 }
 0x130   :  { %188 = vsyncpa [#allocation7], 1 }
 0x131   :  { %189 = vsyncpa [#allocation5], 1 }

</bundles_post_ra>
